<compile_context>
chip_gen: v6e
topology: v6e:2x2x1
jax: 0.10.0
libtpu: 0.0.40
codegen_flags: <defaults>
</compile_context>

<pallas_src>
import functools

import jax
import jax.numpy as jnp
from jax.experimental import pallas as pl
from jax.experimental.pallas import tpu as pltpu


# ----------------------------------------------------------------------------
# Fused Pallas kernel: all GNN layers + readout for the whole (folded) batch
# ----------------------------------------------------------------------------

def _fused_gnn_kernel(xn_ref, xe_ref, A_ref, G_ref, W_ref, b_ref, R_ref, o_ref,
                      *, n_hidden, d, BT):
    """Fused forward, batch folded into rows.

    xn_ref : (2*B*T, d)   node features, row = c*B*T + b*T + t   (c in {neg,pos})
    xe_ref : (4*B*M, d)   edge features, row = ce*B*M + b*M + m  (ce in 0..3)
    A_ref  : (2*B*T, 4*B*M)  aggregate+scatter matrix (edge -> node message passing)
    G_ref  : (4*B*M, 2*B*T)  endpoint gather matrix (node -> edge)
    W_ref  : (n_hidden, 3d, d)  per-layer [Wn; Wm; We] stacks (layers 0..L-2)
    b_ref  : (n_hidden, 8, d)   rows 0/1/2 = bn/bm/be (rest zero padding)
    R_ref  : (2d+8, OUTP)       rows [0:d)=Wn_last@Wr_neg, [d:2d)=Wn_last@Wr_pos,
                                row 2d = fused readout bias (lane-padded)
    o_ref  : (B*T, OUTP)        lane-dense output slab (sliced to out_dim by wrapper)
    """
    f32 = jnp.float32
    xn = xn_ref[...]                      # (2BT, d)
    xe = xe_ref[...]                      # (4BM, d)
    A = A_ref[...]                        # (2BT, 4BM)
    G = G_ref[...]                        # (4BM, 2BT)

    # Hidden layers 0..L-2 (weights in-kernel); static Python loop (n_hidden is tiny).
    for l in range(n_hidden):
        Wn = W_ref[l, 0:d, :]             # (d, d)
        Wm = W_ref[l, d:2 * d, :]
        We = W_ref[l, 2 * d:3 * d, :]
        bn = b_ref[l, 0:1, :]             # (1, d)
        bm = b_ref[l, 1:2, :]
        be = b_ref[l, 2:3, :]

        # node message passing (scatter_add over both endpoints, /2) + node Linear
        node_in = xn + jnp.dot(A, xe, preferred_element_type=f32)          # (2BT, d)
        xn_new = jnp.dot(node_in, Wn, preferred_element_type=f32) + bn     # (2BT, d)

        # edge update: Wm hoisted through the linear gather, G @ (xn @ Wm) == gather @ Wm
        p = jnp.dot(xn, Wm, preferred_element_type=f32)                    # (2BT, d)
        e = xe + jnp.dot(G, p, preferred_element_type=f32) + bm            # (4BM, d)
        xe = jnp.dot(e, We, preferred_element_type=f32) + be               # (4BM, d)

        xn = jnp.maximum(xn_new, 0.0)                                      # ReLU (not last)
        # TODO(synk): F.dropout skipped (dropout=0 / eval mode -> identity)

    # Last layer: node Linear fused into the readout weights (no ReLU after last layer);
    # its edge update is dead and skipped.
    node_in = xn + jnp.dot(A, xe, preferred_element_type=f32)              # (2BT, d)
    y = (jnp.dot(node_in[:BT], R_ref[0:d, :], preferred_element_type=f32)
         + jnp.dot(node_in[BT:2 * BT], R_ref[d:2 * d, :], preferred_element_type=f32)
         + R_ref[2 * d:2 * d + 1, :])
    o_ref[...] = y                                                          # (BT, OUTP)


# ----------------------------------------------------------------------------
# Wrapper (jitted: all constant/layout prep fuses with the pallas_call)
# ----------------------------------------------------------------------------

@jax.jit
def gnn_energy_model_forward(x_1st, x_2nd, edge, params):
    """Full GNN_Energy_Model_1st_Order_02 forward (concat=False, eval mode).

    x_1st: (B, T, 2, d)   x_2nd: (B, M, 4, d)   edge: (2, M) int32
    returns: (B, T, output_dim)
    """
    f32 = jnp.float32
    B, T, _, d = x_1st.shape
    M = x_2nd.shape[1]
    L = len(params["layers"])          # number of GNN_EBM_Layer_01 layers
    n_hidden = L - 1                   # layers whose weights stay in-kernel
    output_dim = params["Wr"].shape[1]
    BT, BM = B * T, B * M

    # ---- scatter / gather matrices, block-diagonal over batch (kron) ----
    E0 = jax.nn.one_hot(edge[0], T, dtype=f32)        # (M, T)
    E1 = jax.nn.one_hot(edge[1], T, dtype=f32)        # (M, T)
    S = 0.5 * (E0 + E1).T                             # (T, M)
    I_B = jnp.eye(B, dtype=f32)
    # node channel c aggregates edge channels {0,1} (c=0) / {2,3} (c=1)
    Cn = jnp.array([[1., 1., 0., 0.], [0., 0., 1., 1.]], f32)       # (2, 4)
    Ci = jax.nn.one_hot(jnp.array([0, 0, 1, 1]), 2, dtype=f32)      # (4, 2) node_i channel
    Cj = jax.nn.one_hot(jnp.array([0, 1, 0, 1]), 2, dtype=f32)      # (4, 2) node_j channel
    A = jnp.kron(Cn, jnp.kron(I_B, S))                              # (2BT, 4BM)
    G = (jnp.kron(Ci, jnp.kron(I_B, E0))
         + jnp.kron(Cj, jnp.kron(I_B, E1)))                         # (4BM, 2BT)

    # ---- fold channel (outermost) + batch into the row axis ----
    xn = jnp.transpose(x_1st, (2, 0, 1, 3)).reshape(2 * BT, d).astype(f32)   # (2BT, d)
    xe = jnp.transpose(x_2nd, (2, 0, 1, 3)).reshape(4 * BM, d).astype(f32)   # (4BM, d)

    # ---- pack hidden-layer weights / biases into two operands ----
    if n_hidden > 0:
        W_all = jnp.stack([
            jnp.concatenate([lp["Wn"], lp["Wm"], lp["We"]], axis=0).astype(f32)
            for lp in params["layers"][:n_hidden]])                 # (n_hidden, 3d, d)
        b_all = jnp.stack([
            jnp.concatenate([lp["bn"], lp["bm"], lp["be"],
                             jnp.zeros((5, d), f32)], axis=0).astype(f32)
            for lp in params["layers"][:n_hidden]])                 # (n_hidden, 8, d)
    else:
        W_all = jnp.zeros((1, 3 * d, d), f32)
        b_all = jnp.zeros((1, 8, d), f32)

    # ---- readout slab: last layer's node Linear fused in, lane-dense padded ----
    OUTP = ((output_dim + 127) // 128) * 128
    pad = OUTP - output_dim
    Wr = params["Wr"].astype(f32)                     # (2d, out_dim)
    br = params["br"].astype(f32)                     # (1, out_dim)
    Wn_last = params["layers"][-1]["Wn"].astype(f32)  # (d, d)
    bn_last = params["layers"][-1]["bn"].astype(f32)  # (1, d)
    Wrn = jnp.pad(Wn_last @ Wr[:d], ((0, 0), (0, pad)))                       # (d, OUTP)
    Wrp = jnp.pad(Wn_last @ Wr[d:], ((0, 0), (0, pad)))                       # (d, OUTP)
    brF = jnp.pad(br + bn_last @ (Wr[:d] + Wr[d:]), ((0, 0), (0, pad)))       # (1, OUTP)
    R = jnp.concatenate([Wrn, Wrp, brF, jnp.zeros((7, OUTP), f32)], axis=0)   # (2d+8, OUTP)

    kernel = functools.partial(_fused_gnn_kernel, n_hidden=n_hidden, d=d, BT=BT)

    # Single invocation, no grid: every operand is a whole-array VMEM block (default specs);
    # all layers + readout run without any HBM round-trips in between.
    out = pl.pallas_call(
        kernel,
        out_shape=jax.ShapeDtypeStruct((BT, OUTP), f32),
    )(xn, xe, A, G, W_all, b_all, R)

    return out.reshape(B, T, OUTP)[:, :, :output_dim]


# ----------------------------------------------------------------------------
# Pure-JAX reference (mirrors the PyTorch semantics) for verification
# ----------------------------------------------------------------------------

def reference_forward(x_1st, x_2nd, edge, params):
    B, T = x_1st.shape[:2]
    e0 = edge[0]
    e1 = edge[1]
    E0 = jax.nn.one_hot(e0, T, dtype=jnp.float32)
    E1 = jax.nn.one_hot(e1, T, dtype=jnp.float32)

    x_node, x_edge = x_1st, x_2nd
    n_layers = len(params["layers"])
    for i, lp in enumerate(params["layers"]):
        # scatter_add over aggregate_indice [0,0,1,1]
        x2_agg = jnp.stack(
            [x_edge[:, :, 0] + x_edge[:, :, 1], x_edge[:, :, 2] + x_edge[:, :, 3]],
            axis=2)                                             # (B,M,2,d)
        upd = []
        for c in range(2):
            xc = x2_agg[:, :, c, :]                             # (B,M,d)
            s = (jnp.einsum("bmd,mt->btd", xc, E1)
                 + jnp.einsum("bmd,mt->btd", xc, E0)) * 0.5
            upd.append(x_node[:, :, c, :] + s)
        xn = jnp.stack(upd, axis=2)                             # (B,T,2,d)
        xn = xn @ lp["Wn"] + lp["bn"]

        ei = x_node[:, e0]                                      # (B,M,2,d)
        ej = x_node[:, e1]
        ei4 = ei[:, :, jnp.array([0, 0, 1, 1]), :]
        ej4 = ej[:, :, jnp.array([0, 1, 0, 1]), :]
        xe = x_edge + ((ei4 + ej4) @ lp["Wm"] + lp["bm"])
        xe = xe @ lp["We"] + lp["be"]

        if i < n_layers - 1:
            xn = jax.nn.relu(xn)
        x_node, x_edge = xn, xe

    h = x_node.reshape(B, T, -1)
    return h @ params["Wr"] + params["br"]


# ----------------------------------------------------------------------------
# Parameter init (deterministic, synthetic)
# ----------------------------------------------------------------------------

def init_params(key, dim, n_layers, output_dim):
    params = {"layers": []}
    for _ in range(n_layers):
        key, *ks = jax.random.split(key, 7)
        scale = 1.0 / jnp.sqrt(dim)
        params["layers"].append({
            "Wn": jax.random.uniform(ks[0], (dim, dim), jnp.float32, -scale, scale),
            "bn": jax.random.uniform(ks[1], (1, dim), jnp.float32, -scale, scale),
            "Wm": jax.random.uniform(ks[2], (dim, dim), jnp.float32, -scale, scale),
            "bm": jax.random.uniform(ks[3], (1, dim), jnp.float32, -scale, scale),
            "We": jax.random.uniform(ks[4], (dim, dim), jnp.float32, -scale, scale),
            "be": jax.random.uniform(ks[5], (1, dim), jnp.float32, -scale, scale),
        })
    key, k1, k2 = jax.random.split(key, 3)
    scale = 1.0 / jnp.sqrt(2 * dim)
    params["Wr"] = jax.random.uniform(k1, (2 * dim, output_dim), jnp.float32, -scale, scale)
    params["br"] = jax.random.uniform(k2, (1, output_dim), jnp.float32, -scale, scale)
    return params


# ----------------------------------------------------------------------------
# Main
# ----------------------------------------------------------------------------

if __name__ == "__main__":
    B, T, M, dim = 2, 8, 12, 32
    ebm_GNN_layer_num = 3          # -> 2 hidden GNN_EBM_Layer_01 layers
    output_dim = 1

    key = jax.random.PRNGKey(0)
    key, kx1, kx2, ke = jax.random.split(key, 4)
    x_1st = jax.random.normal(kx1, (B, T, 2, dim), jnp.float32)
    x_2nd = jax.random.normal(kx2, (B, M, 4, dim), jnp.float32)
    edge = jax.random.randint(ke, (2, M), 0, T, dtype=jnp.int32)

    params = init_params(key, dim, ebm_GNN_layer_num - 1, output_dim)

    out = gnn_energy_model_forward(x_1st, x_2nd, edge, params)
    out = jax.block_until_ready(out)

    ref = reference_forward(x_1st, x_2nd, edge, params)
    assert out.shape == (B, T, output_dim), out.shape
    assert jnp.allclose(out, ref, rtol=2e-4, atol=2e-4), float(jnp.max(jnp.abs(out - ref)))

    print("KERNEL_OK")
</pallas_src>

<mosaic_0001>
module attributes {stable_mosaic.version = 11 : i64} {
  func.func @_fused_gnn_kernel(%arg0: memref<32x32xf32, #tpu.memory_space<vmem>>, %arg1: memref<96x32xf32, #tpu.memory_space<vmem>>, %arg2: memref<32x96xf32, #tpu.memory_space<vmem>>, %arg3: memref<96x32xf32, #tpu.memory_space<vmem>>, %arg4: memref<1x96x32xf32, #tpu.memory_space<vmem>>, %arg5: memref<1x8x32xf32, #tpu.memory_space<vmem>>, %arg6: memref<72x128xf32, #tpu.memory_space<vmem>>, %arg7: memref<16x128xf32, #tpu.memory_space<vmem>>) attributes {dimension_semantics = [], scalar_prefetch = 0 : i64, scratch_operands = 0 : i64, tpu.core_type = #tpu.core_type<tc>} {
    %c0 = arith.constant 0 : index
    %c0_0 = arith.constant 0 : index
    %0 = vector.load %arg0[%c0, %c0_0] : memref<32x32xf32, #tpu.memory_space<vmem>>, vector<32x32xf32>
    %c0_1 = arith.constant 0 : index
    %c0_2 = arith.constant 0 : index
    %1 = vector.load %arg1[%c0_1, %c0_2] : memref<96x32xf32, #tpu.memory_space<vmem>>, vector<96x32xf32>
    %c0_3 = arith.constant 0 : index
    %c0_4 = arith.constant 0 : index
    %2 = vector.load %arg2[%c0_3, %c0_4] : memref<32x96xf32, #tpu.memory_space<vmem>>, vector<32x96xf32>
    %c0_5 = arith.constant 0 : index
    %c0_6 = arith.constant 0 : index
    %3 = vector.load %arg3[%c0_5, %c0_6] : memref<96x32xf32, #tpu.memory_space<vmem>>, vector<96x32xf32>
    %c0_7 = arith.constant 0 : index
    %c0_8 = arith.constant 0 : index
    %c0_9 = arith.constant 0 : index
    %4 = vector.load %arg4[%c0_7, %c0_8, %c0_9] : memref<1x96x32xf32, #tpu.memory_space<vmem>>, vector<1x32x32xf32>
    %5 = vector.shape_cast %4 : vector<1x32x32xf32> to vector<32x32xf32>
    %c0_10 = arith.constant 0 : index
    %c32 = arith.constant 32 : index
    %c0_11 = arith.constant 0 : index
    %6 = vector.load %arg4[%c0_10, %c32, %c0_11] : memref<1x96x32xf32, #tpu.memory_space<vmem>>, vector<1x32x32xf32>
    %7 = vector.shape_cast %6 : vector<1x32x32xf32> to vector<32x32xf32>
    %c0_12 = arith.constant 0 : index
    %c64 = arith.constant 64 : index
    %c0_13 = arith.constant 0 : index
    %8 = vector.load %arg4[%c0_12, %c64, %c0_13] : memref<1x96x32xf32, #tpu.memory_space<vmem>>, vector<1x32x32xf32>
    %9 = vector.shape_cast %8 : vector<1x32x32xf32> to vector<32x32xf32>
    %c0_14 = arith.constant 0 : index
    %c0_15 = arith.constant 0 : index
    %c0_16 = arith.constant 0 : index
    %10 = vector.load %arg5[%c0_14, %c0_15, %c0_16] : memref<1x8x32xf32, #tpu.memory_space<vmem>>, vector<1x1x32xf32>
    %11 = vector.shape_cast %10 : vector<1x1x32xf32> to vector<1x32xf32>
    %c0_17 = arith.constant 0 : index
    %c1 = arith.constant 1 : index
    %c0_18 = arith.constant 0 : index
    %12 = vector.load %arg5[%c0_17, %c1, %c0_18] : memref<1x8x32xf32, #tpu.memory_space<vmem>>, vector<1x1x32xf32>
    %13 = vector.shape_cast %12 : vector<1x1x32xf32> to vector<1x32xf32>
    %c0_19 = arith.constant 0 : index
    %c2 = arith.constant 2 : index
    %c0_20 = arith.constant 0 : index
    %14 = vector.load %arg5[%c0_19, %c2, %c0_20] : memref<1x8x32xf32, #tpu.memory_space<vmem>>, vector<1x1x32xf32>
    %15 = vector.shape_cast %14 : vector<1x1x32xf32> to vector<1x32xf32>
    %cst = arith.constant dense<0.000000e+00> : vector<32x32xf32>
    %16 = tpu.matmul %2, %1, %cst {dimension_numbers = #tpu.dot_dimension_numbers<[1], [0], [0], [1], [0, 0, 1, 1], [], []>} : vector<32x96xf32>, vector<96x32xf32>, vector<32x32xf32> -> vector<32x32xf32>
    %17 = arith.addf %0, %16 : vector<32x32xf32>
    %cst_21 = arith.constant dense<0.000000e+00> : vector<32x32xf32>
    %18 = tpu.matmul %17, %5, %cst_21 {dimension_numbers = #tpu.dot_dimension_numbers<[1], [0], [0], [1], [0, 0, 1, 1], [], []>} : vector<32x32xf32>, vector<32x32xf32>, vector<32x32xf32> -> vector<32x32xf32>
    %19 = vector.broadcast %11 : vector<1x32xf32> to vector<32x32xf32>
    %20 = arith.addf %18, %19 : vector<32x32xf32>
    %cst_22 = arith.constant dense<0.000000e+00> : vector<32x32xf32>
    %21 = tpu.matmul %0, %7, %cst_22 {dimension_numbers = #tpu.dot_dimension_numbers<[1], [0], [0], [1], [0, 0, 1, 1], [], []>} : vector<32x32xf32>, vector<32x32xf32>, vector<32x32xf32> -> vector<32x32xf32>
    %cst_23 = arith.constant dense<0.000000e+00> : vector<96x32xf32>
    %22 = tpu.matmul %3, %21, %cst_23 {dimension_numbers = #tpu.dot_dimension_numbers<[1], [0], [0], [1], [0, 0, 1, 1], [], []>} : vector<96x32xf32>, vector<32x32xf32>, vector<96x32xf32> -> vector<96x32xf32>
    %23 = arith.addf %1, %22 : vector<96x32xf32>
    %24 = vector.broadcast %13 : vector<1x32xf32> to vector<96x32xf32>
    %25 = arith.addf %23, %24 : vector<96x32xf32>
    %cst_24 = arith.constant dense<0.000000e+00> : vector<96x32xf32>
    %26 = tpu.matmul %25, %9, %cst_24 {dimension_numbers = #tpu.dot_dimension_numbers<[1], [0], [0], [1], [0, 0, 1, 1], [], []>} : vector<96x32xf32>, vector<32x32xf32>, vector<96x32xf32> -> vector<96x32xf32>
    %27 = vector.broadcast %15 : vector<1x32xf32> to vector<96x32xf32>
    %28 = arith.addf %26, %27 : vector<96x32xf32>
    %cst_25 = arith.constant 0.000000e+00 : f32
    %29 = vector.broadcast %cst_25 : f32 to vector<32x32xf32>
    %30 = arith.maximumf %20, %29 : vector<32x32xf32>
    %cst_26 = arith.constant dense<0.000000e+00> : vector<32x32xf32>
    %31 = tpu.matmul %2, %28, %cst_26 {dimension_numbers = #tpu.dot_dimension_numbers<[1], [0], [0], [1], [0, 0, 1, 1], [], []>} : vector<32x96xf32>, vector<96x32xf32>, vector<32x32xf32> -> vector<32x32xf32>
    %32 = arith.addf %30, %31 : vector<32x32xf32>
    %33 = vector.extract_strided_slice %32 {offsets = [0, 0], sizes = [16, 32], strides = [1, 1]} : vector<32x32xf32> to vector<16x32xf32>
    %c0_27 = arith.constant 0 : index
    %c0_28 = arith.constant 0 : index
    %34 = vector.load %arg6[%c0_27, %c0_28] : memref<72x128xf32, #tpu.memory_space<vmem>>, vector<32x128xf32>
    %cst_29 = arith.constant dense<0.000000e+00> : vector<16x128xf32>
    %35 = tpu.matmul %33, %34, %cst_29 {dimension_numbers = #tpu.dot_dimension_numbers<[1], [0], [0], [1], [0, 0, 1, 1], [], []>} : vector<16x32xf32>, vector<32x128xf32>, vector<16x128xf32> -> vector<16x128xf32>
    %36 = vector.extract_strided_slice %32 {offsets = [16, 0], sizes = [16, 32], strides = [1, 1]} : vector<32x32xf32> to vector<16x32xf32>
    %c32_30 = arith.constant 32 : index
    %c0_31 = arith.constant 0 : index
    %37 = vector.load %arg6[%c32_30, %c0_31] : memref<72x128xf32, #tpu.memory_space<vmem>>, vector<32x128xf32>
    %cst_32 = arith.constant dense<0.000000e+00> : vector<16x128xf32>
    %38 = tpu.matmul %36, %37, %cst_32 {dimension_numbers = #tpu.dot_dimension_numbers<[1], [0], [0], [1], [0, 0, 1, 1], [], []>} : vector<16x32xf32>, vector<32x128xf32>, vector<16x128xf32> -> vector<16x128xf32>
    %39 = arith.addf %35, %38 : vector<16x128xf32>
    %c64_33 = arith.constant 64 : index
    %c0_34 = arith.constant 0 : index
    %40 = vector.load %arg6[%c64_33, %c0_34] : memref<72x128xf32, #tpu.memory_space<vmem>>, vector<1x128xf32>
    %41 = vector.broadcast %40 : vector<1x128xf32> to vector<16x128xf32>
    %42 = arith.addf %39, %41 : vector<16x128xf32>
    %c0_35 = arith.constant 0 : index
    %c0_36 = arith.constant 0 : index
    %43 = vector.load %arg7[%c0_35, %c0_36] : memref<16x128xf32, #tpu.memory_space<vmem>>, vector<16x128xf32>
    tpu.vector_store %arg7[%c0_35, %c0_36], %42 {strides = array<i32>} : memref<16x128xf32, #tpu.memory_space<vmem>>, vector<16x128xf32>,
    return
  }
}

</mosaic_0001>

<bundles_post_ra>
// kernel: gnn_energy_model_forward.1
= control target key start
LH: loop header
LB: loop body
LE: loop exit
PB: predicated region body
PF: predicated region fallthrough
CT: control target
= control target key end

     0   :  { %vm73_vm0 = vcmask 785408   ;;  %vm179_vm1 = vcmask 261120   ;;  %s1652_s1 = inlined_call_operand.vmem [shape: f32[96,32], index: 1, kind: input, shape index: {}]   ;;  %s1653_s2 = inlined_call_operand.vmem [shape: f32[32,96], index: 2, kind: input, shape index: {}]   ;;  %s1654_s4 = inlined_call_operand.vmem [shape: f32[1,96,32], index: 4, kind: input, shape index: {}]   ;;  %s1655_s0 = inlined_call_operand.vmem [shape: f32[32,32], index: 0, kind: input, shape index: {}]   ;;  %s1656_s3 = inlined_call_operand.vmem [shape: f32[96,32], index: 3, kind: input, shape index: {}]   ;;  %s1657_s5 = inlined_call_operand.vmem [shape: f32[1,8,32], index: 5, kind: input, shape index: {}]   ;;  %s1658_s6 = inlined_call_operand.vmem [shape: f32[72,128], index: 6, kind: input, shape index: {}]   ;;  %s1659_s7 = inlined_call_operand.vmem [shape: f32[16,128], index: 7, kind: output, shape index: {}]  }
   0x1   :  { %v1349_v0 = vld [vmem:[%s1652_s1 + $0x58] sm:$0xff]  ;;  %v1354_v1 = vld [vmem:[%s1652_s1 + $0x50] sm:$0xff]  ;;  %v1361_v2 = vld [vmem:[%s1652_s1 + $0x48] sm:$0xff] }
   0x2   :  { %1144 = vmatprep.subr.mxu0 %v1349_v0  ;;  %v1368_v3 = vld [vmem:[%s1652_s1 + $0x40] sm:$0xff]  ;;  %v61_v5 = vld [vmem:[%s1654_s4 + $0x18] sm:$0xff]  ;;  %v1392_v7 = vld [vmem:[%s1652_s1 + $0x30] sm:$0xff] }
   0x3   :  { %1145 = vmatpush3.msra.mxu0 %v1349_v0  ;;  %v1373_v4 = vld [vmem:[%s1653_s2] sm:$0xff]  ;;  %v1385_v6 = vld [vmem:[%s1652_s1 + $0x38] sm:$0xff]  ;;  %1174 = vmatprep.subr.mxu1 %v61_v5  ;;  %v1399_v8 = vld [vmem:[%s1652_s1 + $0x28] sm:$0xff] }
   0x4   :  { %1146 = vmatprep.subr.mxu0 %v1354_v1  ;;  %1168 = vmatprep.mubr.msk.f32.mxu0 %vm73_vm0, %v1373_v4  ;;  %v1406_v9 = vld [vmem:[%s1652_s1 + $0x20] sm:$0xff]  ;;  %v1413_v10 = vld [vmem:[%s1652_s1 + $0x18] sm:$0xff]  ;;  %v1420_v11 = vld [vmem:[%s1652_s1 + $0x10] sm:$0xff] }
   0x5   :  { %1147 = vmatpush3.msra.mxu0 %v1354_v1  ;;  %1175 = vmatpush3.msra.mxu1 %v61_v5  ;;  %v1427_v12 = vld [vmem:[%s1652_s1 + $0x8] sm:$0xff]  ;;  %v1434_v13 = vld [vmem:[%s1652_s1] sm:$0xff]  ;;  %v1447_v15 = vld [vmem:[%s1653_s2 + $0x10] sm:$0xff] }
   0x6   :  { %1148 = vmatprep.subr.mxu0 %v1361_v2  ;;  %v1441_v14 = vld [vmem:[%s1653_s2 + $0x8] sm:$0xff]  ;;  %v1457_v16 = vld [vmem:[%s1653_s2 + $0x18] sm:$0xff]  ;;  %v60_v17 = vld [vmem:[%s1654_s4 + $0x10] sm:$0xff] }
   0x7   :  { %1149 = vmatpush3.msra.mxu0 %v1361_v2  ;;  %1176 = vmatprep.subr.mxu1 %v60_v17  ;;  %v59_v18 = vld [vmem:[%s1654_s4 + $0x8] sm:$0xff]  ;;  %v58_v19 = vld [vmem:[%s1654_s4] sm:$0xff]  ;;  %v65_v20 = vld [vmem:[%s1654_s4 + $0x38] sm:$0xff] }
   0x8   :  { %1150 = vmatprep.subr.mxu0 %v1368_v3  ;;  %1177 = vmatpush3.msra.mxu1 %v60_v17  ;;  %v26_v22 = vld [vmem:[%s1655_s0] sm:$0xff]  ;;  %v27_v23 = vld [vmem:[%s1655_s0 + $0x8] sm:$0xff]  ;;  %v28_v28 = vld [vmem:[%s1655_s0 + $0x10] sm:$0xff] }
   0x9   :  { %1151 = vmatpush3.msra.mxu0 %v1368_v3  ;;  %1178 = vmatprep.subr.mxu1 %v59_v18  ;;  %v29_v29 = vld [vmem:[%s1655_s0 + $0x18] sm:$0xff]  ;;  %v64_v30 = vld [vmem:[%s1654_s4 + $0x30] sm:$0xff]  ;;  %v63_v33 = vld [vmem:[%s1654_s4 + $0x28] sm:$0xff] }
   0xa   :  { %1152 = vmatprep.subr.mxu0 %v1385_v6  ;;  %1179 = vmatpush3.msra.mxu1 %v59_v18  ;;  %v62_v35 = vld [vmem:[%s1654_s4 + $0x20] sm:$0xff]  ;;  %v47_v45 = vld [vmem:[%s1656_s3 + $0x8] sm:$0xff]  ;;  %v48_v46 = vld [vmem:[%s1656_s3 + $0x10] sm:$0xff] }
   0xb   :  { %1153 = vmatpush3.msra.mxu0 %v1385_v6  ;;  %1180 = vmatprep.subr.mxu1 %v58_v19  ;;  %v46_v36 = vld [vmem:[%s1656_s3] sm:$0xff]  ;;  %v49_v47 = vld [vmem:[%s1656_s3 + $0x18] sm:$0xff]  ;;  %v51_v49 = vld [vmem:[%s1656_s3 + $0x28] sm:$0xff] }
   0xc   :  { %1154 = vmatprep.subr.mxu0 %v1392_v7  ;;  %1181 = vmatpush3.msra.mxu1 %v58_v19  ;;  %v50_v48 = vld [vmem:[%s1656_s3 + $0x20] sm:$0xff]  ;;  %v52_v50 = vld [vmem:[%s1656_s3 + $0x30] sm:$0xff]  ;;  %v53_v51 = vld [vmem:[%s1656_s3 + $0x38] sm:$0xff] }
   0xd   :  { %1155 = vmatpush3.msra.mxu0 %v1392_v7  ;;  %1188 = vmatprep.subr.mxu1 %v65_v20  ;;  %v54_v52 = vld [vmem:[%s1656_s3 + $0x40] sm:$0xff]  ;;  %v55_v53 = vld [vmem:[%s1656_s3 + $0x48] sm:$0xff]  ;;  %v56_v54 = vld [vmem:[%s1656_s3 + $0x50] sm:$0xff] }
   0xe   :  { %1156 = vmatprep.subr.mxu0 %v1399_v8  ;;  %v57_v55 = vld [vmem:[%s1656_s3 + $0x58] sm:$0xff]  ;;  %v68_v57 = vld [vmem:[%s1654_s4 + $0x50] sm:$0xff]  ;;  %v67_v58 = vld [vmem:[%s1654_s4 + $0x48] sm:$0xff] }
   0xf   :  { %1157 = vmatpush3.msra.mxu0 %v1399_v8  ;;  %v69_v56 = vld [vmem:[%s1654_s4 + $0x58] sm:$0xff]  ;;  %v66_v59 = vld [vmem:[%s1654_s4 + $0x40] sm:$0xff] }
  0x10   :  { %1158 = vmatprep.subr.mxu0 %v1406_v9  ;;  %v1029_v63 = vld [vmem:[%s1657_s5 + $0x1] ss:$0 sm:$0xff] }
  0x11   :  { %1159 = vmatpush3.msra.mxu0 %v1406_v9 }
  0x12   :  { %1160 = vmatprep.subr.mxu0 %v1413_v10 }
  0x13   :  { %1161 = vmatpush3.msra.mxu0 %v1413_v10 }
  0x14   :  { %1162 = vmatprep.subr.mxu0 %v1420_v11 }
  0x15   :  { %1163 = vmatpush3.msra.mxu0 %v1420_v11 }
  0x16   :  { %1164 = vmatprep.subr.mxu0 %v1427_v12 }
  0x17   :  { %1165 = vmatpush3.msra.mxu0 %v1427_v12 }
  0x18   :  { %1166 = vmatprep.subr.mxu0 %v1434_v13 }
  0x19   :  { %1167 = vmatpush3.msra.mxu0 %v1434_v13 }
  0x1a   :  { %1169 = vmatmul.mubr.msk.f32.vlgmr.msra.gmra.mxu0 %vm73_vm0, %v1441_v14  ;;  %1228 = vmatprep.subr.mxu0 %v69_v56 }
  0x1b   :  { %1171 = vmatprep.mubr.msk.f32.mxu0 %vm73_vm0, %v1447_v15  ;;  %1229 = vmatpush3.msra.mxu0 %v69_v56 }
  0x1c   :  { %1230 = vmatprep.subr.mxu0 %v68_v57 }
  0x1d   :  { %1231 = vmatpush3.msra.mxu0 %v68_v57 }
  0x1e   :  { %1172 = vmatmul.mubr.msk.f32.gmra.mxu0 %vm73_vm0, %v1457_v16  ;;  %1232 = vmatprep.subr.mxu0 %v67_v58 }
  0x1f   :  { %1233 = vmatpush3.msra.mxu0 %v67_v58 }
  0x20   :  { %1234 = vmatprep.subr.mxu0 %v66_v59 }
  0x21   :  { %1235 = vmatpush3.msra.mxu0 %v66_v59 }
  0xda   :  { %v1170_v21 = vpop.f32.mrf.mxu0 }
  0xdb   :  { %v172_v26 = vadd.f32 %v1170_v21, %v27_v23 }
  0xdc   :  { %v152_v24 = vpop.f32.mrf.mxu0 }
  0xdd   :  { %v171_v25 = vadd.f32 %v152_v24, %v26_v22 }
  0xde   :  { %v1173_v27 = vpop.f32.mrf.mxu0 }
  0xdf   :  { %1182 = vmatprep.mubr.msk.f32.mxu1 %vm179_vm1, %v171_v25  ;;  %v174_v34 = vadd.f32 %v1173_v27, %v29_v29 }
  0xe0   :  { %v162_v31 = vpop.f32.mrf.mxu0  ;;  %1183 = vmatmul.mubr.msk.f32.vlgmr.msra.gmra.mxu1 %vm179_vm1, %v172_v26 }
  0xe1   :  { %v173_v32 = vadd.f32 %v162_v31, %v28_v28  ;;  %1189 = vmatpush3.msra.mxu1 %v65_v20 }
  0xe2   :  { %1190 = vmatprep.subr.mxu1 %v64_v30 }
  0xe3   :  { %1185 = vmatprep.mubr.msk.f32.mxu1 %vm179_vm1, %v173_v32  ;;  %1191 = vmatpush3.msra.mxu1 %v64_v30 }
  0xe4   :  { %1186 = vmatmul.mubr.msk.f32.gmra.mxu1 %vm179_vm1, %v174_v34  ;;  %1192 = vmatprep.subr.mxu1 %v63_v33 }
  0xe5   :  { %1193 = vmatpush3.msra.mxu1 %v63_v33  ;;  %1196 = vmatprep.mubr.msk.f32.mxu1 %vm179_vm1, %v26_v22 }
  0xe6   :  { %1194 = vmatprep.subr.mxu1 %v62_v35 }
  0xe7   :  { %1195 = vmatpush3.msra.mxu1 %v62_v35 }
  0xe8   :  { %1197 = vmatmul.mubr.msk.f32.vlgmr.msra.gmra.mxu1 %vm179_vm1, %v27_v23 }
  0xe9   :  { %1199 = vmatprep.mubr.msk.f32.mxu1 %vm179_vm1, %v28_v28 }
  0xec   :  { %1200 = vmatmul.mubr.msk.f32.gmra.mxu1 %vm179_vm1, %v29_v29 }
  0xed   :  { %1210 = vmatprep.mubr.msk.f32.mxu1 %vm179_vm1, %v46_v36 }
 0x1a0   :  { %v1506_v37 = vpop.f32.mrf.mxu1 }
 0x1a2   :  { %v1508_v38 = vpop.f32.mrf.mxu1 }
 0x1a4   :  { %v1510_v39 = vpop.f32.mrf.mxu1 }
 0x1a6   :  { %v1512_v40 = vpop.f32.mrf.mxu1 }
 0x1a8   :  { %v1198_v41 = vpop.f32.mrf.mxu1 }
 0x1aa   :  { %v355_v42 = vpop.f32.mrf.mxu1 }
 0x1ac   :  { %v1201_v43 = vpop.f32.mrf.mxu1 }
 0x1ad   :  { %1202 = vmatprep.subr.mxu1 %v1201_v43 }
 0x1ae   :  { %v365_v44 = vpop.f32.mrf.mxu1  ;;  %1203 = vmatpush3.msra.mxu1 %v1201_v43 }
 0x1af   :  { %1204 = vmatprep.subr.mxu1 %v365_v44 }
 0x1b0   :  { %1205 = vmatpush3.msra.mxu1 %v365_v44 }
 0x1b1   :  { %1206 = vmatprep.subr.mxu1 %v1198_v41 }
 0x1b2   :  { %1207 = vmatpush3.msra.mxu1 %v1198_v41 }
 0x1b3   :  { %1208 = vmatprep.subr.mxu1 %v355_v42 }
 0x1b4   :  { %1209 = vmatpush3.msra.mxu1 %v355_v42 }
 0x1b5   :  { %1211 = vmatmul.mubr.msk.f32.vlgmr.msra.gmra.mxu1 %vm179_vm1, %v47_v45 }
 0x1b6   :  { %1213 = vmatprep.mubr.msk.f32.mxu1 %vm179_vm1, %v48_v46 }
 0x1b9   :  { %1214 = vmatmul.mubr.msk.f32.gmra.mxu1 %vm179_vm1, %v49_v47 }
 0x1ba   :  { %1216 = vmatprep.mubr.msk.f32.mxu1 %vm179_vm1, %v50_v48 }
 0x1bd   :  { %1217 = vmatmul.mubr.msk.f32.gmra.mxu1 %vm179_vm1, %v51_v49 }
 0x1be   :  { %1219 = vmatprep.mubr.msk.f32.mxu1 %vm179_vm1, %v52_v50 }
 0x1c1   :  { %1220 = vmatmul.mubr.msk.f32.gmra.mxu1 %vm179_vm1, %v53_v51 }
 0x1c2   :  { %1222 = vmatprep.mubr.msk.f32.mxu1 %vm179_vm1, %v54_v52 }
 0x1c5   :  { %1223 = vmatmul.mubr.msk.f32.gmra.mxu1 %vm179_vm1, %v55_v53  ;;  %v1030_v53 = vld [vmem:[%s1657_s5 + $0x2] ss:$0 sm:$0xff] }
 0x1c6   :  { %1225 = vmatprep.mubr.msk.f32.mxu1 %vm179_vm1, %v56_v54 }
 0x1c9   :  { %1226 = vmatmul.mubr.msk.f32.gmra.mxu1 %vm179_vm1, %v57_v55 }
 0x1ca   :  { %1278 = vmatprep.mubr.msk.f32.mxu1 %vm73_vm0, %v1373_v4 }
 0x275   :  { %v1212_v60 = vpop.f32.mrf.mxu1 }
 0x276   :  { %v536_v61 = vadd.f32 %v1212_v60, %v1427_v12 }
 0x277   :  { %v476_v62 = vpop.f32.mrf.mxu1 }
 0x278   :  { %v535_v4 = vadd.f32 %v476_v62, %v1434_v13  ;;  %v552_v18 = vadd.f32 %v1029_v63, %v536_v61 }
 0x279   :  { %v1215_v5 = vpop.f32.mrf.mxu1 }
 0x27a   :  { %v551_v17 = vadd.f32 %v1029_v63, %v535_v4  ;;  %v538_v19 = vadd.f32 %v1215_v5, %v1413_v10 }
 0x27b   :  { %v486_v20 = vpop.f32.mrf.mxu1 }
 0x27c   :  { %v537_v21 = vadd.f32 %v486_v20, %v1420_v11  ;;  %1236 = vmatprep.mubr.msk.f32.mxu0 %vm179_vm1, %v551_v17  ;;  %v554_v23 = vadd.f32 %v1029_v63, %v538_v19  ;;  %v824_v19 = vld [vmem:[%s1658_s6 + $0x18] sm:$0xff]  ;;  %v823_v20 = vld [vmem:[%s1658_s6 + $0x10] sm:$0xff] }
 0x27d   :  { %v1218_v22 = vpop.f32.mrf.mxu1  ;;  %1237 = vmatmul.mubr.msk.f32.vlgmr.msra.gmra.mxu0 %vm179_vm1, %v552_v18 }
 0x27e   :  { %v553_v12 = vadd.f32 %v1029_v63, %v537_v21  ;;  %v540_v24 = vadd.f32 %v1218_v22, %v1399_v8  ;;  %v822_v21 = vld [vmem:[%s1658_s6 + $0x8] sm:$0xff] }
 0x27f   :  { %v496_v25 = vpop.f32.mrf.mxu1 }
 0x280   :  { %v539_v13 = vadd.f32 %v496_v25, %v1406_v9  ;;  %1239 = vmatprep.mubr.msk.f32.mxu0 %vm179_vm1, %v553_v12  ;;  %v556_v27 = vadd.f32 %v1029_v63, %v540_v24 }
 0x281   :  { %v1221_v26 = vpop.f32.mrf.mxu1  ;;  %1240 = vmatmul.mubr.msk.f32.gmra.mxu0 %vm179_vm1, %v554_v23 }
 0x282   :  { %v555_v10 = vadd.f32 %v1029_v63, %v539_v13  ;;  %v542_v11 = vadd.f32 %v1221_v26, %v1385_v6 }
 0x283   :  { %v506_v28 = vpop.f32.mrf.mxu1 }
 0x284   :  { %v541_v29 = vadd.f32 %v506_v28, %v1392_v7  ;;  %1242 = vmatprep.mubr.msk.f32.mxu0 %vm179_vm1, %v555_v10  ;;  %v558_v31 = vadd.f32 %v1029_v63, %v542_v11 }
 0x285   :  { %v1224_v30 = vpop.f32.mrf.mxu1  ;;  %1243 = vmatmul.mubr.msk.f32.gmra.mxu0 %vm179_vm1, %v556_v27 }
 0x286   :  { %v557_v8 = vadd.f32 %v1029_v63, %v541_v29  ;;  %v544_v9 = vadd.f32 %v1224_v30, %v1361_v2 }
 0x287   :  { %v516_v32 = vpop.f32.mrf.mxu1 }
 0x288   :  { %v543_v33 = vadd.f32 %v516_v32, %v1368_v3  ;;  %1245 = vmatprep.mubr.msk.f32.mxu0 %vm179_vm1, %v557_v8  ;;  %v560_v35 = vadd.f32 %v1029_v63, %v544_v9  ;;  %v828_v3 = vld [vmem:[%s1658_s6 + $0x38] sm:$0xff] }
 0x289   :  { %v1227_v34 = vpop.f32.mrf.mxu1  ;;  %1246 = vmatmul.mubr.msk.f32.gmra.mxu0 %vm179_vm1, %v558_v31  ;;  %1284 = vmatprep.subr.mxu0 %v828_v3 }
 0x28a   :  { %v559_v6 = vadd.f32 %v1029_v63, %v543_v33  ;;  %v546_v7 = vadd.f32 %v1227_v34, %v1349_v0  ;;  %v827_v0 = vld [vmem:[%s1658_s6 + $0x30] sm:$0xff]  ;;  %1285 = vmatpush3.msra.mxu0 %v828_v3 }
 0x28b   :  { %v526_v36 = vpop.f32.mrf.mxu1  ;;  %1286 = vmatprep.subr.mxu0 %v827_v0 }
 0x28c   :  { %v545_v41 = vadd.f32 %v526_v36, %v1354_v1  ;;  %1248 = vmatprep.mubr.msk.f32.mxu0 %vm179_vm1, %v559_v6  ;;  %v562_v42 = vadd.f32 %v1029_v63, %v546_v7  ;;  %v826_v1 = vld [vmem:[%s1658_s6 + $0x28] sm:$0xff]  ;;  %1287 = vmatpush3.msra.mxu0 %v827_v0 }
 0x28d   :  { %1249 = vmatmul.mubr.msk.f32.gmra.mxu0 %vm179_vm1, %v560_v35  ;;  %1288 = vmatprep.subr.mxu0 %v826_v1 }
 0x28e   :  { %v561_v2 = vadd.f32 %v1029_v63, %v545_v41  ;;  %1289 = vmatpush3.msra.mxu0 %v826_v1 }
 0x290   :  { %1251 = vmatprep.mubr.msk.f32.mxu0 %vm179_vm1, %v561_v2 }
 0x291   :  { %1252 = vmatmul.mubr.msk.f32.gmra.mxu0 %vm179_vm1, %v562_v42 }
 0x33d   :  { %v1238_v43 = vpop.f32.mrf.mxu0 }
 0x33e   :  { %v675_v17 = vadd.f32 %v1238_v43, %v1030_v53 }
 0x33f   :  { %v669_v44 = vpop.f32.mrf.mxu0 }
 0x340   :  { %v670_v18 = vadd.f32 %v1030_v53, %v669_v44 }
 0x341   :  { %v1241_v45 = vpop.f32.mrf.mxu0 }
 0x342   :  { %v685_v4 = vadd.f32 %v1241_v45, %v1030_v53 }
 0x343   :  { %v679_v46 = vpop.f32.mrf.mxu0 }
 0x344   :  { %v680_v5 = vadd.f32 %v1030_v53, %v679_v46 }
 0x345   :  { %v1244_v47 = vpop.f32.mrf.mxu0 }
 0x346   :  { %v695_v62 = vadd.f32 %v1244_v47, %v1030_v53 }
 0x347   :  { %v689_v48 = vpop.f32.mrf.mxu0 }
 0x348   :  { %v690_v63 = vadd.f32 %v1030_v53, %v689_v48 }
 0x349   :  { %v1247_v49 = vpop.f32.mrf.mxu0 }
 0x34a   :  { %v705_v60 = vadd.f32 %v1247_v49, %v1030_v53 }
 0x34b   :  { %v699_v50 = vpop.f32.mrf.mxu0 }
 0x34c   :  { %v700_v61 = vadd.f32 %v1030_v53, %v699_v50 }
 0x34d   :  { %v1250_v51 = vpop.f32.mrf.mxu0 }
 0x34e   :  { %v715_v58 = vadd.f32 %v1250_v51, %v1030_v53 }
 0x34f   :  { %v709_v52 = vpop.f32.mrf.mxu0 }
 0x350   :  { %v710_v59 = vadd.f32 %v1030_v53, %v709_v52 }
 0x351   :  { %v1253_v54 = vpop.f32.mrf.mxu0 }
 0x352   :  { %v725_v55 = vadd.f32 %v1253_v54, %v1030_v53 }
 0x353   :  { %v719_v56 = vpop.f32.mrf.mxu0 }
 0x354   :  { %v720_v57 = vadd.f32 %v1030_v53, %v719_v56  ;;  %1254 = vmatprep.subr.mxu1 %v725_v55 }
 0x355   :  { %1255 = vmatpush3.msra.mxu1 %v725_v55 }
 0x356   :  { %1256 = vmatprep.subr.mxu1 %v720_v57 }
 0x357   :  { %1257 = vmatpush3.msra.mxu1 %v720_v57 }
 0x358   :  { %1258 = vmatprep.subr.mxu1 %v715_v58 }
 0x359   :  { %1259 = vmatpush3.msra.mxu1 %v715_v58 }
 0x35a   :  { %1260 = vmatprep.subr.mxu1 %v710_v59 }
 0x35b   :  { %1261 = vmatpush3.msra.mxu1 %v710_v59 }
 0x35c   :  { %1262 = vmatprep.subr.mxu1 %v705_v60 }
 0x35d   :  { %1263 = vmatpush3.msra.mxu1 %v705_v60 }
 0x35e   :  { %1264 = vmatprep.subr.mxu1 %v700_v61 }
 0x35f   :  { %1265 = vmatpush3.msra.mxu1 %v700_v61 }
 0x360   :  { %1266 = vmatprep.subr.mxu1 %v695_v62 }
 0x361   :  { %1267 = vmatpush3.msra.mxu1 %v695_v62 }
 0x362   :  { %1268 = vmatprep.subr.mxu1 %v690_v63 }
 0x363   :  { %1269 = vmatpush3.msra.mxu1 %v690_v63 }
 0x364   :  { %1270 = vmatprep.subr.mxu1 %v685_v4 }
 0x365   :  { %1271 = vmatpush3.msra.mxu1 %v685_v4 }
 0x366   :  { %1272 = vmatprep.subr.mxu1 %v680_v5 }
 0x367   :  { %1273 = vmatpush3.msra.mxu1 %v680_v5 }
 0x368   :  { %1274 = vmatprep.subr.mxu1 %v675_v17 }
 0x369   :  { %1275 = vmatpush3.msra.mxu1 %v675_v17 }
 0x36a   :  { %1276 = vmatprep.subr.mxu1 %v670_v18 }
 0x36b   :  { %1277 = vmatpush3.msra.mxu1 %v670_v18 }
 0x36c   :  { %1279 = vmatmul.mubr.msk.f32.vlgmr.msra.gmra.mxu1 %vm73_vm0, %v1441_v14  ;;  %1295 = vmatprep.subr.mxu1 %v824_v19  ;;  %v821_v14 = vld [vmem:[%s1658_s6] sm:$0xff] }
 0x36d   :  { %1281 = vmatprep.mubr.msk.f32.mxu1 %vm73_vm0, %v1447_v15  ;;  %1296 = vmatpush3.msra.mxu1 %v824_v19  ;;  %v825_v15 = vld [vmem:[%s1658_s6 + $0x20] sm:$0xff] }
 0x36e   :  { %1297 = vmatprep.subr.mxu1 %v823_v20  ;;  %1290 = vmatprep.subr.mxu0 %v825_v15 }
 0x36f   :  { %1298 = vmatpush3.msra.mxu1 %v823_v20  ;;  %1291 = vmatpush3.msra.mxu0 %v825_v15 }
 0x370   :  { %1282 = vmatmul.mubr.msk.f32.gmra.mxu1 %vm73_vm0, %v1457_v16  ;;  %1299 = vmatprep.subr.mxu1 %v822_v21  ;;  %v1008_v16 = vld [vmem:[%s1657_s5] ss:$0 sm:$0xff] }
 0x371   :  { %1300 = vmatpush3.msra.mxu1 %v822_v21  ;;  %v259_v22 = vadd.f32 %v1008_v16, %v1508_v38  ;;  %v264_v12 = vadd.f32 %v1506_v37, %v1008_v16  ;;  %v269_v25 = vadd.f32 %v1008_v16, %v1512_v40  ;;  %v274_v26 = vadd.f32 %v1510_v39, %v1008_v16  ;;  %v1051_v39 = vld [vmem:[%s1658_s6 + $0x40] ss:$0 sm:$0xff] }
 0x372   :  { %1301 = vmatprep.subr.mxu1 %v821_v14 }
 0x373   :  { %1302 = vmatpush3.msra.mxu1 %v821_v14  ;;  %v728_v24 = vmax.f32 %v259_v22, 0.0  ;;  %v729_v13 = vmax.f32 %v264_v12, 0.0  ;;  %v730_v29 = vmax.f32 %v269_v25, 0.0  ;;  %v731_v30 = vmax.f32 %v274_v26, 0.0 }
 0x42c   :  { %v1280_v23 = vpop.f32.mrf.mxu1 }
 0x42d   :  { %v818_v11 = vadd.f32 %v1280_v23, %v729_v13 }
 0x42e   :  { %v798_v10 = vpop.f32.mrf.mxu1 }
 0x42f   :  { %v817_v27 = vadd.f32 %v798_v10, %v728_v24 }
 0x430   :  { %v1283_v28 = vpop.f32.mrf.mxu1 }
 0x431   :  { %1303 = vmatprep.mubr.msk.f32.mxu1 %vm179_vm1, %v817_v27  ;;  %v820_v37 = vadd.f32 %v1283_v28, %v731_v30 }
 0x432   :  { %v808_v8 = vpop.f32.mrf.mxu1  ;;  %1304 = vmatmul.mubr.msk.f32.vlgmr.msra.gmra.mxu1 %vm179_vm1, %v818_v11 }
 0x433   :  { %v819_v38 = vadd.f32 %v808_v8, %v730_v29 }
 0x435   :  { %1292 = vmatprep.mubr.msk.f32.mxu0 %vm179_vm1, %v819_v38 }
 0x436   :  { %1293 = vmatmul.mubr.msk.f32.vlgmr.msra.gmra.mxu0 %vm179_vm1, %v820_v37 }
 0x4f2   :  { %v1305_v40 = vpop.f32.mrf.mxu1 }
 0x4f4   :  { %v982_v32 = vpop.f32.mrf.mxu1 }
 0x4f6   :  { %v1294_v31 = vpop.f32.mrf.mxu0 }
 0x4f7   :  { %v988_v9 = vadd.f32 %v1305_v40, %v1294_v31 }
 0x4f8   :  { %v901_v33 = vpop.f32.mrf.mxu0 }
 0x4f9   :  { %v997_v34 = vadd.f32 %v1051_v39, %v988_v9  ;;  %v983_v6 = vadd.f32 %v982_v32, %v901_v33 }
 0x4fb   :  { %999 = vst [vmem:[%s1659_s7 + $0x8] sm:$0xff] %v997_v34  ;;  %v996_v35 = vadd.f32 %v1051_v39, %v983_v6 }
 0x4fd   :  { %998 = vst [vmem:[%s1659_s7] sm:$0xff] %v996_v35 }

</bundles_post_ra>
